<compile_context>
chip_gen: v7x
topology: tpu7x:2x2x1
jax: 0.10.0
libtpu: 0.0.40
codegen_flags: <defaults>
</compile_context>

<pallas_src>
import jax
import jax.numpy as jnp
from jax.experimental import pallas as pl
from jax.experimental.pallas import tpu as pltpu

_SUBLANE = 8
_LANE = 128
# Max samples per grid step: x block 1 MiB + out block 4 MiB (f32), ~10 MiB
# when double-buffered -- safe on every generation, including v7x's 64 MiB VMEM.
_MAX_TILE_SAMPLES = 256 * 1024


def _cdiv(a, b):
    return -(-a // b)


def _round_up(n, m):
    return ((n + m - 1) // m) * m


def _generator_kernel(w1_ref, b1_ref, w2_ref, b2_ref, x_ref, o_ref):
    """One batch tile.

    x_ref : (TILE_R, LANES) f32 in VMEM   -- batch slab, sublane + lane dense
    w1/b1/w2/b2 : tiny f32 params in SMEM, read as scalars
    o_ref : (4, TILE_R, LANES) f32 in VMEM -- one dense slab per output feature
    """
    x = x_ref[...]                                            # (TILE_R, LANES)

    # Hidden layer (Linear(1, 3) + Sigmoid): K = 1 -> pure VPU broadcast MACs;
    # jax.nn.sigmoid keeps the exp on the EUP slot.
    h = [jax.nn.sigmoid(w1_ref[0, j] * x + b1_ref[0, j]) for j in range(3)]

    # Output layer (Linear(3, 4) + Sigmoid): 3 broadcast MACs + bias per feature.
    # Direct per-feature stores: no concatenate/relayout, unmasked dense vst.
    for k in range(4):
        acc = (h[0] * w2_ref[0, k]
               + h[1] * w2_ref[1, k]
               + h[2] * w2_ref[2, k]
               + b2_ref[0, k])
        o_ref[k] = jax.nn.sigmoid(acc)                        # (TILE_R, LANES)


def generator_forward(x, w1, b1, w2, b2, *, feature_major=False):
    """x: (B, 1) float32 -> (B, 4) float32  (or (4, B) if feature_major=True)."""
    B = x.shape[0]
    x_flat = x.reshape(-1).astype(jnp.float32)                # (B,)

    # Lane width of the batch slab: tiny batches (the actual GAN usage) use a
    # single 128-lane tile with minimal padding; large batches use wide slabs
    # so every DMA is a large contiguous transfer.
    lanes = _LANE if B <= _SUBLANE * _LANE else 8 * _LANE

    rows = _round_up(max(1, _cdiv(B, lanes)), _SUBLANE)       # sublane-dense rows
    max_tile_rows = max(_SUBLANE, _MAX_TILE_SAMPLES // lanes)
    tile_rows = min(max_tile_rows, rows)
    if rows >= 2 * _SUBLANE:
        # Keep >= 2 grid steps so the "parallel" axis can feed both v7x TCs.
        tile_rows = min(tile_rows, _round_up(_cdiv(rows, 2), _SUBLANE))
    rows = _round_up(rows, tile_rows)
    n_pad = rows * lanes
    grid = rows // tile_rows

    # Single cheap pad + free reshape; sample b lives at (b // lanes, b % lanes).
    x_slab = jnp.pad(x_flat, (0, n_pad - B)).reshape(rows, lanes)

    smem = pl.BlockSpec(memory_space=pltpu.MemorySpace.SMEM)

    out = pl.pallas_call(
        _generator_kernel,
        out_shape=jax.ShapeDtypeStruct((4, rows, lanes), jnp.float32),
        grid=(grid,),
        in_specs=[
            smem,                                             # w1 (1, 3)
            smem,                                             # b1 (1, 3)
            smem,                                             # w2 (3, 4)
            smem,                                             # b2 (1, 4)
            pl.BlockSpec((tile_rows, lanes), lambda i: (i, 0)),   # x slab
        ],
        out_specs=pl.BlockSpec((4, tile_rows, lanes), lambda i: (0, i, 0)),
        compiler_params=pltpu.CompilerParams(
            dimension_semantics=("parallel",),                # megacore on v7x
            vmem_limit_bytes=32 * 1024 * 1024,                # safe on 64 MiB v7x
        ),
        cost_estimate=pl.CostEstimate(
            flops=30 * n_pad,                                 # ~30 MACs/adds per sample
            transcendentals=7 * n_pad,                        # 7 sigmoids per sample
            bytes_accessed=4 * 5 * n_pad + 4 * 19,            # 4B in + 16B out / sample
        ),
    )(w1, b1, w2, b2, x_slab)

    out_fm = out.reshape(4, n_pad)[:, :B]                     # (4, B), feature-major
    if feature_major:
        return out_fm                                         # skip the transpose pass
    return out_fm.T                                           # (B, 4) -- PyTorch layout


def generator_reference(x, w1, b1, w2, b2):
    h = jax.nn.sigmoid(x @ w1 + b1)
    return jax.nn.sigmoid(h @ w2 + b2)


if __name__ == "__main__":
    key = jax.random.PRNGKey(0)
    k_x, k_x2, k_w1, k_b1, k_w2, k_b2 = jax.random.split(key, 6)

    # Parameters of nn.Linear(1, 3) / nn.Linear(3, 4), stored pre-transposed
    # as (in_features, out_features); biases kept 2D (1, out).
    w1 = jax.random.normal(k_w1, (1, 3), dtype=jnp.float32) * 0.5
    b1 = jax.random.normal(k_b1, (1, 3), dtype=jnp.float32) * 0.1
    w2 = jax.random.normal(k_w2, (3, 4), dtype=jnp.float32) * 0.5
    b2 = jax.random.normal(k_b2, (1, 4), dtype=jnp.float32) * 0.1

    # Small batch (typical GAN usage): single 128-lane tile path.
    B = 8
    x = jax.random.uniform(k_x, (B, 1), dtype=jnp.float32)
    out = jax.block_until_ready(generator_forward(x, w1, b1, w2, b2))
    ref = generator_reference(x, w1, b1, w2, b2)
    assert out.shape == (B, 4)
    assert jnp.allclose(out, ref, atol=1e-5, rtol=1e-5), "mismatch vs reference (B=8)"

    # Larger, non-tile-multiple batch: exercises the wide slab + multi-step
    # "parallel" grid + padding path.
    B2 = 40_000
    x2 = jax.random.uniform(k_x2, (B2, 1), dtype=jnp.float32)
    out2 = jax.block_until_ready(generator_forward(x2, w1, b1, w2, b2))
    ref2 = generator_reference(x2, w1, b1, w2, b2)
    assert out2.shape == (B2, 4)
    assert jnp.allclose(out2, ref2, atol=1e-5, rtol=1e-5), "mismatch vs reference (B=40000)"

    print("KERNEL_OK")
</pallas_src>

<mosaic_0001>
module attributes {stable_mosaic.version = 11 : i64} {
  func.func @_generator_kernel(%arg0: i32, %arg1: memref<1x3xf32, #tpu.memory_space<smem>>, %arg2: memref<1x3xf32, #tpu.memory_space<smem>>, %arg3: memref<3x4xf32, #tpu.memory_space<smem>>, %arg4: memref<1x4xf32, #tpu.memory_space<smem>>, %arg5: memref<8x128xf32, #tpu.memory_space<vmem>>, %arg6: memref<4x8x128xf32, #tpu.memory_space<vmem>>) attributes {dimension_semantics = [#tpu.dimension_semantics<parallel>], iteration_bounds = array<i64: 1>, scalar_prefetch = 0 : i64, scratch_operands = 0 : i64, tpu.core_type = #tpu.core_type<tc>, window_params = [{transform_indices = @transform_0, window_bounds = array<i64: 1, 3>}, {transform_indices = @transform_1, window_bounds = array<i64: 1, 3>}, {transform_indices = @transform_2, window_bounds = array<i64: 3, 4>}, {transform_indices = @transform_3, window_bounds = array<i64: 1, 4>}, {transform_indices = @transform_4, window_bounds = array<i64: 8, 128>}, {transform_indices = @transform_5, window_bounds = array<i64: 4, 8, 128>}]} {
    %c0 = arith.constant 0 : index
    %c0_0 = arith.constant 0 : index
    %0 = vector.load %arg5[%c0, %c0_0] : memref<8x128xf32, #tpu.memory_space<vmem>>, vector<8x128xf32>
    %c0_1 = arith.constant 0 : index
    %c0_2 = arith.constant 0 : index
    %1 = memref.load %arg1[%c0_1, %c0_2] : memref<1x3xf32, #tpu.memory_space<smem>>
    %2 = vector.broadcast %1 : f32 to vector<8x128xf32>
    %3 = arith.mulf %2, %0 : vector<8x128xf32>
    %c0_3 = arith.constant 0 : index
    %c0_4 = arith.constant 0 : index
    %4 = memref.load %arg2[%c0_3, %c0_4] : memref<1x3xf32, #tpu.memory_space<smem>>
    %5 = vector.broadcast %4 : f32 to vector<8x128xf32>
    %6 = arith.addf %3, %5 : vector<8x128xf32>
    %7 = arith.negf %6 : vector<8x128xf32>
    %8 = math.exp %7 : vector<8x128xf32>
    %cst = arith.constant 1.000000e+00 : f32
    %9 = vector.broadcast %cst : f32 to vector<8x128xf32>
    %10 = arith.addf %9, %8 : vector<8x128xf32>
    %11 = arith.divf %9, %10 : vector<8x128xf32>
    %c0_5 = arith.constant 0 : index
    %c1 = arith.constant 1 : index
    %12 = memref.load %arg1[%c0_5, %c1] : memref<1x3xf32, #tpu.memory_space<smem>>
    %13 = vector.broadcast %12 : f32 to vector<8x128xf32>
    %14 = arith.mulf %13, %0 : vector<8x128xf32>
    %c0_6 = arith.constant 0 : index
    %c1_7 = arith.constant 1 : index
    %15 = memref.load %arg2[%c0_6, %c1_7] : memref<1x3xf32, #tpu.memory_space<smem>>
    %16 = vector.broadcast %15 : f32 to vector<8x128xf32>
    %17 = arith.addf %14, %16 : vector<8x128xf32>
    %18 = arith.negf %17 : vector<8x128xf32>
    %19 = math.exp %18 : vector<8x128xf32>
    %cst_8 = arith.constant 1.000000e+00 : f32
    %20 = vector.broadcast %cst_8 : f32 to vector<8x128xf32>
    %21 = arith.addf %20, %19 : vector<8x128xf32>
    %22 = arith.divf %20, %21 : vector<8x128xf32>
    %c0_9 = arith.constant 0 : index
    %c2 = arith.constant 2 : index
    %23 = memref.load %arg1[%c0_9, %c2] : memref<1x3xf32, #tpu.memory_space<smem>>
    %24 = vector.broadcast %23 : f32 to vector<8x128xf32>
    %25 = arith.mulf %24, %0 : vector<8x128xf32>
    %c0_10 = arith.constant 0 : index
    %c2_11 = arith.constant 2 : index
    %26 = memref.load %arg2[%c0_10, %c2_11] : memref<1x3xf32, #tpu.memory_space<smem>>
    %27 = vector.broadcast %26 : f32 to vector<8x128xf32>
    %28 = arith.addf %25, %27 : vector<8x128xf32>
    %29 = arith.negf %28 : vector<8x128xf32>
    %30 = math.exp %29 : vector<8x128xf32>
    %cst_12 = arith.constant 1.000000e+00 : f32
    %31 = vector.broadcast %cst_12 : f32 to vector<8x128xf32>
    %32 = arith.addf %31, %30 : vector<8x128xf32>
    %33 = arith.divf %31, %32 : vector<8x128xf32>
    %c0_13 = arith.constant 0 : index
    %c0_14 = arith.constant 0 : index
    %34 = memref.load %arg3[%c0_13, %c0_14] : memref<3x4xf32, #tpu.memory_space<smem>>
    %35 = vector.broadcast %34 : f32 to vector<8x128xf32>
    %36 = arith.mulf %11, %35 : vector<8x128xf32>
    %c1_15 = arith.constant 1 : index
    %c0_16 = arith.constant 0 : index
    %37 = memref.load %arg3[%c1_15, %c0_16] : memref<3x4xf32, #tpu.memory_space<smem>>
    %38 = vector.broadcast %37 : f32 to vector<8x128xf32>
    %39 = arith.mulf %22, %38 : vector<8x128xf32>
    %40 = arith.addf %36, %39 : vector<8x128xf32>
    %c2_17 = arith.constant 2 : index
    %c0_18 = arith.constant 0 : index
    %41 = memref.load %arg3[%c2_17, %c0_18] : memref<3x4xf32, #tpu.memory_space<smem>>
    %42 = vector.broadcast %41 : f32 to vector<8x128xf32>
    %43 = arith.mulf %33, %42 : vector<8x128xf32>
    %44 = arith.addf %40, %43 : vector<8x128xf32>
    %c0_19 = arith.constant 0 : index
    %c0_20 = arith.constant 0 : index
    %45 = memref.load %arg4[%c0_19, %c0_20] : memref<1x4xf32, #tpu.memory_space<smem>>
    %46 = vector.broadcast %45 : f32 to vector<8x128xf32>
    %47 = arith.addf %44, %46 : vector<8x128xf32>
    %48 = arith.negf %47 : vector<8x128xf32>
    %49 = math.exp %48 : vector<8x128xf32>
    %cst_21 = arith.constant 1.000000e+00 : f32
    %50 = vector.broadcast %cst_21 : f32 to vector<8x128xf32>
    %51 = arith.addf %50, %49 : vector<8x128xf32>
    %52 = arith.divf %50, %51 : vector<8x128xf32>
    %c0_22 = arith.constant 0 : index
    %c0_23 = arith.constant 0 : index
    %c0_24 = arith.constant 0 : index
    %53 = vector.load %arg6[%c0_22, %c0_23, %c0_24] : memref<4x8x128xf32, #tpu.memory_space<vmem>>, vector<1x8x128xf32>
    %54 = vector.shape_cast %53 : vector<1x8x128xf32> to vector<8x128xf32>
    %55 = vector.shape_cast %52 : vector<8x128xf32> to vector<1x8x128xf32>
    tpu.vector_store %arg6[%c0_22, %c0_23, %c0_24], %55 {strides = array<i32>} : memref<4x8x128xf32, #tpu.memory_space<vmem>>, vector<1x8x128xf32>,
    %c0_25 = arith.constant 0 : index
    %c1_26 = arith.constant 1 : index
    %56 = memref.load %arg3[%c0_25, %c1_26] : memref<3x4xf32, #tpu.memory_space<smem>>
    %57 = vector.broadcast %56 : f32 to vector<8x128xf32>
    %58 = arith.mulf %11, %57 : vector<8x128xf32>
    %c1_27 = arith.constant 1 : index
    %c1_28 = arith.constant 1 : index
    %59 = memref.load %arg3[%c1_27, %c1_28] : memref<3x4xf32, #tpu.memory_space<smem>>
    %60 = vector.broadcast %59 : f32 to vector<8x128xf32>
    %61 = arith.mulf %22, %60 : vector<8x128xf32>
    %62 = arith.addf %58, %61 : vector<8x128xf32>
    %c2_29 = arith.constant 2 : index
    %c1_30 = arith.constant 1 : index
    %63 = memref.load %arg3[%c2_29, %c1_30] : memref<3x4xf32, #tpu.memory_space<smem>>
    %64 = vector.broadcast %63 : f32 to vector<8x128xf32>
    %65 = arith.mulf %33, %64 : vector<8x128xf32>
    %66 = arith.addf %62, %65 : vector<8x128xf32>
    %c0_31 = arith.constant 0 : index
    %c1_32 = arith.constant 1 : index
    %67 = memref.load %arg4[%c0_31, %c1_32] : memref<1x4xf32, #tpu.memory_space<smem>>
    %68 = vector.broadcast %67 : f32 to vector<8x128xf32>
    %69 = arith.addf %66, %68 : vector<8x128xf32>
    %70 = arith.negf %69 : vector<8x128xf32>
    %71 = math.exp %70 : vector<8x128xf32>
    %cst_33 = arith.constant 1.000000e+00 : f32
    %72 = vector.broadcast %cst_33 : f32 to vector<8x128xf32>
    %73 = arith.addf %72, %71 : vector<8x128xf32>
    %74 = arith.divf %72, %73 : vector<8x128xf32>
    %c1_34 = arith.constant 1 : index
    %c0_35 = arith.constant 0 : index
    %c0_36 = arith.constant 0 : index
    %75 = vector.load %arg6[%c1_34, %c0_35, %c0_36] : memref<4x8x128xf32, #tpu.memory_space<vmem>>, vector<1x8x128xf32>
    %76 = vector.shape_cast %75 : vector<1x8x128xf32> to vector<8x128xf32>
    %77 = vector.shape_cast %74 : vector<8x128xf32> to vector<1x8x128xf32>
    tpu.vector_store %arg6[%c1_34, %c0_35, %c0_36], %77 {strides = array<i32>} : memref<4x8x128xf32, #tpu.memory_space<vmem>>, vector<1x8x128xf32>,
    %c0_37 = arith.constant 0 : index
    %c2_38 = arith.constant 2 : index
    %78 = memref.load %arg3[%c0_37, %c2_38] : memref<3x4xf32, #tpu.memory_space<smem>>
    %79 = vector.broadcast %78 : f32 to vector<8x128xf32>
    %80 = arith.mulf %11, %79 : vector<8x128xf32>
    %c1_39 = arith.constant 1 : index
    %c2_40 = arith.constant 2 : index
    %81 = memref.load %arg3[%c1_39, %c2_40] : memref<3x4xf32, #tpu.memory_space<smem>>
    %82 = vector.broadcast %81 : f32 to vector<8x128xf32>
    %83 = arith.mulf %22, %82 : vector<8x128xf32>
    %84 = arith.addf %80, %83 : vector<8x128xf32>
    %c2_41 = arith.constant 2 : index
    %c2_42 = arith.constant 2 : index
    %85 = memref.load %arg3[%c2_41, %c2_42] : memref<3x4xf32, #tpu.memory_space<smem>>
    %86 = vector.broadcast %85 : f32 to vector<8x128xf32>
    %87 = arith.mulf %33, %86 : vector<8x128xf32>
    %88 = arith.addf %84, %87 : vector<8x128xf32>
    %c0_43 = arith.constant 0 : index
    %c2_44 = arith.constant 2 : index
    %89 = memref.load %arg4[%c0_43, %c2_44] : memref<1x4xf32, #tpu.memory_space<smem>>
    %90 = vector.broadcast %89 : f32 to vector<8x128xf32>
    %91 = arith.addf %88, %90 : vector<8x128xf32>
    %92 = arith.negf %91 : vector<8x128xf32>
    %93 = math.exp %92 : vector<8x128xf32>
    %cst_45 = arith.constant 1.000000e+00 : f32
    %94 = vector.broadcast %cst_45 : f32 to vector<8x128xf32>
    %95 = arith.addf %94, %93 : vector<8x128xf32>
    %96 = arith.divf %94, %95 : vector<8x128xf32>
    %c2_46 = arith.constant 2 : index
    %c0_47 = arith.constant 0 : index
    %c0_48 = arith.constant 0 : index
    %97 = vector.load %arg6[%c2_46, %c0_47, %c0_48] : memref<4x8x128xf32, #tpu.memory_space<vmem>>, vector<1x8x128xf32>
    %98 = vector.shape_cast %97 : vector<1x8x128xf32> to vector<8x128xf32>
    %99 = vector.shape_cast %96 : vector<8x128xf32> to vector<1x8x128xf32>
    tpu.vector_store %arg6[%c2_46, %c0_47, %c0_48], %99 {strides = array<i32>} : memref<4x8x128xf32, #tpu.memory_space<vmem>>, vector<1x8x128xf32>,
    %c0_49 = arith.constant 0 : index
    %c3 = arith.constant 3 : index
    %100 = memref.load %arg3[%c0_49, %c3] : memref<3x4xf32, #tpu.memory_space<smem>>
    %101 = vector.broadcast %100 : f32 to vector<8x128xf32>
    %102 = arith.mulf %11, %101 : vector<8x128xf32>
    %c1_50 = arith.constant 1 : index
    %c3_51 = arith.constant 3 : index
    %103 = memref.load %arg3[%c1_50, %c3_51] : memref<3x4xf32, #tpu.memory_space<smem>>
    %104 = vector.broadcast %103 : f32 to vector<8x128xf32>
    %105 = arith.mulf %22, %104 : vector<8x128xf32>
    %106 = arith.addf %102, %105 : vector<8x128xf32>
    %c2_52 = arith.constant 2 : index
    %c3_53 = arith.constant 3 : index
    %107 = memref.load %arg3[%c2_52, %c3_53] : memref<3x4xf32, #tpu.memory_space<smem>>
    %108 = vector.broadcast %107 : f32 to vector<8x128xf32>
    %109 = arith.mulf %33, %108 : vector<8x128xf32>
    %110 = arith.addf %106, %109 : vector<8x128xf32>
    %c0_54 = arith.constant 0 : index
    %c3_55 = arith.constant 3 : index
    %111 = memref.load %arg4[%c0_54, %c3_55] : memref<1x4xf32, #tpu.memory_space<smem>>
    %112 = vector.broadcast %111 : f32 to vector<8x128xf32>
    %113 = arith.addf %110, %112 : vector<8x128xf32>
    %114 = arith.negf %113 : vector<8x128xf32>
    %115 = math.exp %114 : vector<8x128xf32>
    %cst_56 = arith.constant 1.000000e+00 : f32
    %116 = vector.broadcast %cst_56 : f32 to vector<8x128xf32>
    %117 = arith.addf %116, %115 : vector<8x128xf32>
    %118 = arith.divf %116, %117 : vector<8x128xf32>
    %c3_57 = arith.constant 3 : index
    %c0_58 = arith.constant 0 : index
    %c0_59 = arith.constant 0 : index
    %119 = vector.load %arg6[%c3_57, %c0_58, %c0_59] : memref<4x8x128xf32, #tpu.memory_space<vmem>>, vector<1x8x128xf32>
    %120 = vector.shape_cast %119 : vector<1x8x128xf32> to vector<8x128xf32>
    %121 = vector.shape_cast %118 : vector<8x128xf32> to vector<1x8x128xf32>
    tpu.vector_store %arg6[%c3_57, %c0_58, %c0_59], %121 {strides = array<i32>} : memref<4x8x128xf32, #tpu.memory_space<vmem>>, vector<1x8x128xf32>,
    return
  }
  func.func @transform_0(%arg0: i32) -> (i32, i32) {
    %c0_i32 = arith.constant 0 : i32
    %c0_i32_0 = arith.constant 0 : i32
    %c0_i32_1 = arith.constant 0 : i32
    return %c0_i32, %c0_i32_0 : i32, i32
  }
  func.func @transform_1(%arg0: i32) -> (i32, i32) {
    %c0_i32 = arith.constant 0 : i32
    %c0_i32_0 = arith.constant 0 : i32
    %c0_i32_1 = arith.constant 0 : i32
    return %c0_i32, %c0_i32_0 : i32, i32
  }
  func.func @transform_2(%arg0: i32) -> (i32, i32) {
    %c0_i32 = arith.constant 0 : i32
    %c0_i32_0 = arith.constant 0 : i32
    %c0_i32_1 = arith.constant 0 : i32
    return %c0_i32, %c0_i32_0 : i32, i32
  }
  func.func @transform_3(%arg0: i32) -> (i32, i32) {
    %c0_i32 = arith.constant 0 : i32
    %c0_i32_0 = arith.constant 0 : i32
    %c0_i32_1 = arith.constant 0 : i32
    return %c0_i32, %c0_i32_0 : i32, i32
  }
  func.func @transform_4(%arg0: i32) -> (i32, i32) {
    %c0_i32 = arith.constant 0 : i32
    %c0_i32_0 = arith.constant 0 : i32
    return %arg0, %c0_i32 : i32, i32
  }
  func.func @transform_5(%arg0: i32) -> (i32, i32, i32) {
    %c0_i32 = arith.constant 0 : i32
    %c0_i32_0 = arith.constant 0 : i32
    %c0_i32_1 = arith.constant 0 : i32
    return %c0_i32, %arg0, %c0_i32_0 : i32, i32, i32
  }
}

</mosaic_0001>

<bundles_post_ra>
// kernel: tpu_custom_call.1
= control target key start
LH: loop header
LB: loop body
LE: loop exit
PB: predicated region body
PF: predicated region fallthrough
CT: control target
= control target key end

     0   :  { %10 = vsyncpa [#allocation4], 0  ;;  %s455_s0 = inlined_call_operand.hbm [shape: f32[1,3], index: 0, kind: input, shape index: {}]   ;;  %s456_s1 = inlined_call_operand.vmem [shape: f32[1,3], index: 1, kind: input, shape index: {}]   ;;  %s457_s2 = inlined_call_operand.vmem [shape: f32[3,4], index: 2, kind: input, shape index: {}]   ;;  %s458_s3 = inlined_call_operand.vmem [shape: f32[1,4], index: 3, kind: input, shape index: {}]   ;;  %s459_s4 = inlined_call_operand.vmem [shape: f32[8,128], index: 4, kind: input, shape index: {}]   ;;  %s460_s5 = inlined_call_operand.hbm [shape: f32[4,8,128], index: 5, kind: output, shape index: {}]  }
   0x1   :  { %11 = vsyncpa [#allocation5], 0 }
   0x2   :  { %12 = vsyncpa [#allocation8], 0  ;;  %s38_s20 = sshll.u32 %s457_s2, 4  ;;  %s39_s20 = int_to_ptr.vmem [resolvable:$true] %s38_s20 }
   0x3   :  { %13 = vsyncpa [#allocation3], 0  ;;  %s270_s21 = scalar_lea.vmem %s39_s20, 64  ;;  %p275_p1 = scmp.lt.s32.totalorder %s39_s20, %s39_s20 }
   0x4   :  { %p271_p0 = scmp.ne.s32.totalorder %s39_s20, %s270_s21  ;;  %p276_p2 = scmp.lt.s32.totalorder %s270_s21, %s270_s21 }
   0x6   :  { %p277_p3 = por %p276_p2, %p275_p1 }
   0x8   :  { %p278_p4 = pnand %p277_p3, %p271_p0 }
   0xa   :  { %281 = shalt.err (!%p278_p4)
}
   0xb   :  { %s346_s22 = smov [#allocation7]   ;;  %s282_s25 = scalar_lea.hbm %s455_s0, 16 }
   0xc   :  { %41 = dma.vmem_to_smem %s39_s20, 64, %s346_s22, [#allocation8]  }
   0xd   :  { %p283_p5 = scmp.ne.s32.totalorder %s455_s0, %s282_s25  ;;  %p286_p6 = scmp.lt.u32.totalorder %s282_s25, %s455_s0 }
   0xf   :  { %p288_p7 = pnand %p286_p6, %p283_p5 }
  0x11   :  { %291 = shalt.err (!%p288_p7)
}
  0x12   :  { %s347_s29 = smov [#allocation2]   ;;  %s28_s9 = sshll.u32 %s456_s1, 4  ;;  %s29_s9 = int_to_ptr.vmem [resolvable:$true] %s28_s9 }
  0x13   :  { %21 = dma.hbm_to_smem %s455_s0, 16, %s347_s29, [#allocation4]  }
  0x14   :  { %s48_s12 = sshll.u32 %s458_s3, 4  ;;  %s292_s13 = scalar_lea.vmem %s29_s9, 16  ;;  %s49_s12 = int_to_ptr.vmem [resolvable:$true] %s48_s12 }
  0x15   :  { %p293_p8 = scmp.ne.s32.totalorder %s29_s9, %s292_s13  ;;  %p297_p9 = scmp.lt.s32.totalorder %s29_s9, %s29_s9 }
  0x16   :  { %p298_p10 = scmp.lt.s32.totalorder %s292_s13, %s292_s13 }
  0x18   :  { %p299_p11 = por %p298_p10, %p297_p9 }
  0x1a   :  { %p300_p12 = pnand %p299_p11, %p293_p8 }
  0x1c   :  { %303 = shalt.err (!%p300_p12)
}
  0x1d   :  { %s348_s14 = smov [#allocation6]   ;;  %s304_s0 = scalar_lea.vmem %s49_s12, 16 }
  0x1e   :  { %31 = dma.vmem_to_smem %s29_s9, 16, %s348_s14, [#allocation5]  }
  0x1f   :  { %p305_p13 = scmp.ne.s32.totalorder %s49_s12, %s304_s0  ;;  %p309_p0 = scmp.lt.s32.totalorder %s49_s12, %s49_s12 }
  0x20   :  { %p310_p1 = scmp.lt.s32.totalorder %s304_s0, %s304_s0 }
  0x22   :  { %p311_p2 = por %p310_p1, %p309_p0 }
  0x24   :  { %p312_p3 = pnand %p311_p2, %p305_p13 }
  0x26   :  { %315 = shalt.err (!%p312_p3)
}
  0x27   :  { %s349_s1 = smov [#allocation9]  }
  0x28   :  { %51 = dma.vmem_to_smem %s49_s12, 16, %s349_s1, [#allocation8]  }
  0x29   :  { %338 = dma.done.wait [#allocation4], 16  }
  0x2a   :  { %339 = vsyncadd [#allocation4], 4294967280 }
  0x2b   :  { %340 = dma.done.wait [#allocation5], 16  }
  0x2c   :  { %341 = vsyncadd [#allocation5], 4294967280 }
  0x2d   :  { %342 = dma.done.wait [#allocation8], 80  }
  0x2e   :  { %343 = vsyncadd [#allocation8], 4294967216 }
  0x2f   :  { %66 = sfence }
  0x30   :  { %s68_s3 = sld [smem:[#allocation2]]  ;;  %s211_s16 = sld [smem:[#allocation2 + $0x1]]  ;;  %v67_v0 = vld [vmem:[%s459_s4] sm:$0xff] }
  0x31   :  { %s71_s15 = sld [smem:[#allocation6]]  ;;  %s212_s17 = sld [smem:[#allocation6 + $0x1]] }
  0x32   :  { %s214_s18 = sld [smem:[#allocation2 + $0x2]]  ;;  %s407_s4 = sld [smem:[#allocation7]] }
  0x33   :  { %s215_s19 = sld [smem:[#allocation6 + $0x2]]  ;;  %s409_s22 = sld [smem:[#allocation7 + $0x80]] }
  0x34   :  { %s411_s23 = sld [smem:[#allocation7 + $0x100]]  ;;  %s413_s24 = sld [smem:[#allocation7 + $0x1]] }
  0x35   :  { %s415_s25 = sld [smem:[#allocation7 + $0x81]]  ;;  %s225_s27 = sld [smem:[#allocation7 + $0x2]] }
  0x36   :  { %v69_v1 = vstv %s68_s3  ;;  %v81_v4 = vstv %s211_s16  ;;  %s417_s26 = sld [smem:[#allocation7 + $0x101]]  ;;  %s230_s2 = sld [smem:[#allocation7 + $0x3]] }
  0x37   :  { %v72_v2 = vstv %s71_s15  ;;  %v70_v3 = vmul.f32 %v69_v1, %v67_v0  ;;  %v84_v5 = vstv %s212_s17  ;;  %v82_v6 = vmul.f32 %v81_v4, %v67_v0  ;;  %s226_s28 = sld [smem:[#allocation7 + $0x82]]  ;;  %s231_s29 = sld [smem:[#allocation7 + $0x83]] }
  0x38   :  { %v93_v7 = vstv %s214_s18  ;;  %s419_s30 = sld [smem:[#allocation7 + $0x102]]  ;;  %s421_s6 = sld [smem:[#allocation7 + $0x103]]  ;;  %v105_v22 = vstv %s407_s4 }
  0x39   :  { %v96_v8 = vstv %s215_s19  ;;  %v73_v9 = vadd.f32 %v72_v2, %v70_v3  ;;  %v94_v10 = vmul.f32 %v93_v7, %v67_v0  ;;  %v85_v11 = vadd.f32 %v84_v5, %v82_v6  ;;  %s423_s7 = sld [smem:[#allocation9]]  ;;  %s425_s8 = sld [smem:[#allocation9 + $0x1]] }
  0x3a   :  { %s427_s9 = sld [smem:[#allocation9 + $0x2]]  ;;  %s429_s10 = sld [smem:[#allocation9 + $0x3]]  ;;  %v126_v23 = vstv %s413_s24  ;;  %v108_v26 = vstv %s409_s22  ;;  %v112_v31 = vstv %s411_s23 }
  0x3b   :  { %v210_v12 = vmul.f32 -1.442695, %v73_v9  ;;  %v97_v13 = vadd.f32 %v96_v8, %v94_v10  ;;  %v213_v14 = vmul.f32 -1.442695, %v85_v11  ;;  %v148_v24 = vstv %s225_s27  ;;  %s350_s11 = smov [#allocation10]  }
  0x3c   :  { %v170_v25 = vstv %s230_s2  ;;  %v129_v27 = vstv %s415_s25  ;;  %v133_v32 = vstv %s417_s26  ;;  %s196_s12 = sshll.u32 %s350_s11, 4  ;;  %s197_s12 = int_to_ptr.vmem [resolvable:$true] %s196_s12 }
  0x3d   :  { %242 = vpow2.f32 %v210_v12  ;;  %v216_v15 = vmul.f32 -1.442695, %v97_v13  ;;  %v151_v28 = vstv %s226_s28  ;;  %v173_v29 = vstv %s231_s29  ;;  %s316_s13 = scalar_lea.vmem %s197_s12, 512  ;;  %p321_p5 = scmp.lt.s32.totalorder %s197_s12, %s197_s12 }
  0x3e   :  { %244 = vpow2.f32 %v213_v14  ;;  %v155_v33 = vstv %s419_s30  ;;  %v177_v34 = vstv %s421_s6  ;;  %p317_p4 = scmp.ne.s32.totalorder %s197_s12, %s316_s13  ;;  %p322_p6 = scmp.lt.s32.totalorder %s316_s13, %s316_s13 }
  0x3f   :  { %246 = vpow2.f32 %v216_v15  ;;  %v116_v53 = vstv %s423_s7  ;;  %v137_v54 = vstv %s425_s8 }
  0x40   :  { %v159_v55 = vstv %s427_s9  ;;  %v181_v56 = vstv %s429_s10  ;;  %p323_p7 = por %p322_p6, %p321_p5 }
  0x42   :  { %p324_p8 = pnand %p323_p7, %p317_p4 }
  0x47   :  { %v243_v16 = vpop.eup %242 }
  0x48   :  { %v245_v17 = vpop.eup %244  ;;  %v77_v18 = vadd.f32 1.0, %v243_v16 }
  0x49   :  { %v247_v19 = vpop.eup %246  ;;  %v89_v20 = vadd.f32 1.0, %v245_v17 }
  0x4a   :  { %248 = vrcp.f32 %v77_v18  ;;  %v101_v21 = vadd.f32 1.0, %v247_v19 }
  0x4b   :  { %250 = vrcp.f32 %v89_v20 }
  0x4c   :  { %252 = vrcp.f32 %v101_v21 }
  0x54   :  { %v249_v30 = vpop.eup %248 }
  0x55   :  { %v251_v35 = vpop.eup %250  ;;  %v106_v36 = vmul.f32 %v249_v30, %v105_v22  ;;  %v127_v37 = vmul.f32 %v249_v30, %v126_v23  ;;  %v149_v38 = vmul.f32 %v249_v30, %v148_v24  ;;  %v171_v39 = vmul.f32 %v249_v30, %v170_v25 }
  0x56   :  { %v253_v40 = vpop.eup %252  ;;  %v109_v41 = vmul.f32 %v251_v35, %v108_v26  ;;  %v130_v42 = vmul.f32 %v251_v35, %v129_v27  ;;  %v152_v43 = vmul.f32 %v251_v35, %v151_v28  ;;  %v174_v44 = vmul.f32 %v251_v35, %v173_v29 }
  0x57   :  { %v113_v45 = vmul.f32 %v253_v40, %v112_v31  ;;  %v134_v46 = vmul.f32 %v253_v40, %v133_v32  ;;  %v156_v47 = vmul.f32 %v253_v40, %v155_v33  ;;  %v178_v48 = vmul.f32 %v253_v40, %v177_v34 }
  0x58   :  { %v110_v49 = vadd.f32 %v109_v41, %v106_v36  ;;  %v131_v50 = vadd.f32 %v130_v42, %v127_v37  ;;  %v153_v51 = vadd.f32 %v152_v43, %v149_v38  ;;  %v175_v52 = vadd.f32 %v174_v44, %v171_v39 }
  0x5a   :  { %v114_v57 = vadd.f32 %v113_v45, %v110_v49  ;;  %v135_v58 = vadd.f32 %v134_v46, %v131_v50  ;;  %v157_v59 = vadd.f32 %v156_v47, %v153_v51  ;;  %v179_v60 = vadd.f32 %v178_v48, %v175_v52 }
  0x5c   :  { %v117_v61 = vadd.f32 %v116_v53, %v114_v57  ;;  %v138_v62 = vadd.f32 %v137_v54, %v135_v58  ;;  %v160_v63 = vadd.f32 %v159_v55, %v157_v59  ;;  %v182_v0 = vadd.f32 %v181_v56, %v179_v60 }
  0x5e   :  { %v219_v1 = vmul.f32 -1.442695, %v117_v61  ;;  %v224_v2 = vmul.f32 -1.442695, %v138_v62  ;;  %v229_v3 = vmul.f32 -1.442695, %v160_v63 }
  0x5f   :  { %v234_v4 = vmul.f32 -1.442695, %v182_v0 }
  0x60   :  { %254 = vpow2.f32 %v219_v1 }
  0x61   :  { %256 = vpow2.f32 %v224_v2 }
  0x62   :  { %258 = vpow2.f32 %v229_v3 }
  0x63   :  { %260 = vpow2.f32 %v234_v4 }
  0x6a   :  { %v255_v5 = vpop.eup %254 }
  0x6b   :  { %v257_v6 = vpop.eup %256  ;;  %v121_v7 = vadd.f32 1.0, %v255_v5 }
  0x6c   :  { %v259_v8 = vpop.eup %258  ;;  %v142_v9 = vadd.f32 1.0, %v257_v6 }
  0x6d   :  { %v261_v10 = vpop.eup %260  ;;  %262 = vrcp.f32 %v121_v7  ;;  %v164_v11 = vadd.f32 1.0, %v259_v8 }
  0x6e   :  { %264 = vrcp.f32 %v142_v9  ;;  %v186_v12 = vadd.f32 1.0, %v261_v10 }
  0x6f   :  { %266 = vrcp.f32 %v164_v11 }
  0x70   :  { %268 = vrcp.f32 %v186_v12 }
  0x77   :  { %v263_v13 = vpop.eup %262 }
  0x78   :  { %v265_v14 = vpop.eup %264  ;;  %124 = vst [vmem:[#allocation10] sm:$0xff] %v263_v13 }
  0x79   :  { %v267_v15 = vpop.eup %266  ;;  %146 = vst [vmem:[#allocation10 + $0x8] sm:$0xff] %v265_v14 }
  0x7a   :  { %v269_v16 = vpop.eup %268  ;;  %168 = vst [vmem:[#allocation10 + $0x10] sm:$0xff] %v267_v15 }
  0x7b   :  { %190 = vst [vmem:[#allocation10 + $0x18] sm:$0xff] %v269_v16 }
  0x7c   :  { %327 = shalt.err (!%p324_p8)
}
  0x7d   :  { %s328_s1 = scalar_lea.hbm %s460_s5, 512 }
  0x7e   :  { %p329_p9 = scmp.ne.s32.totalorder %s460_s5, %s328_s1  ;;  %p332_p10 = scmp.lt.u32.totalorder %s328_s1, %s460_s5 }
  0x80   :  { %p334_p11 = pnand %p332_p10, %p329_p9 }
  0x82   :  { %337 = shalt.err (!%p334_p11)
}
  0x83   :  { %s351_s18 = smov 128   ;;  %s352_s19 = smov 8  }
  0x84   :  { %202 = dma.vmem_to_hbm [thread:$0]  %s197_s12, 512, %s460_s5, [#allocation3], %s351_s18, %s351_s18, %s352_s19  }
  0x85   :  { %344 = dma.done.wait [#allocation3], 512  }
  0x86   :  { %345 = vsyncadd [#allocation3], 4294966784 }
  0x87   :  { %206 = vsyncpa [#allocation3], 1 }
  0x88   :  { %207 = vsyncpa [#allocation4], 1 }
  0x89   :  { %208 = vsyncpa [#allocation5], 1 }
  0x8a   :  { %209 = vsyncpa [#allocation8], 1 }

</bundles_post_ra>
